<compile_context>
chip_gen: v6e
topology: v6e:2x2x1
jax: 0.10.0
libtpu: 0.0.40
codegen_flags: <defaults>
</compile_context>

<pallas_src>
import functools

import jax
import jax.numpy as jnp
import numpy as np
from jax.experimental import pallas as pl
from jax.experimental.pallas import tpu as pltpu

BN_EPS = 1e-5


def _round_up(x, m):
    return ((x + m - 1) // m) * m


def _encoder_kernel(num_hidden, inject_flags, matmul_dtype, *refs):
    """Fused encoder forward.

    Ref order (inputs then output):
      x                    (TB, F)       f32            batch-tiled
      [categs]             (TB, Cpad)    f32            batch-tiled (if covariates)
      per hidden layer l:
        W_l                (Kpad, Hpad)  matmul_dtype   resident
        [Wc_l]             (Cpad, Hpad)  f32            resident (if injected)
        s_l                (1, Hpad)     f32            resident (BN scale)
        b_l                (1, Hpad)     f32            resident (folded bias)
      head:
        W_h                (Hpad, Npad)  matmul_dtype   resident
        [Wc_h]             (Cpad, Npad)  f32            resident (if injected)
        b_h                (1, Npad)     f32            resident
      out                  (TB, Npad)    f32            batch-tiled
    """
    idx = 0
    x_ref = refs[idx]; idx += 1
    cat = None
    if any(inject_flags):
        cat = refs[idx][...]          # (TB, Cpad) f32 one-hot block, reused every layer
        idx += 1

    # Cast activations inside the kernel so the wrapper never pays an extra HBM
    # pass to pre-cast / pad x.
    h = x_ref[...].astype(matmul_dtype)

    for l in range(num_hidden):
        w_ref = refs[idx]; idx += 1
        acc = jnp.dot(h, w_ref[...], preferred_element_type=jnp.float32)
        if inject_flags[l]:
            wc_ref = refs[idx]; idx += 1
            acc = acc + jnp.dot(cat, wc_ref[...], preferred_element_type=jnp.float32)
        s_ref = refs[idx]; b_ref = refs[idx + 1]; idx += 2
        # BatchNorm (running stats) applied in the f32 epilogue: z = acc*s + b_fold,
        # keeping the bf16 weights un-scaled for better numerics.
        z = acc * s_ref[...] + b_ref[...]
        # ReLU; Dropout(p=0.2) is identity in eval mode.
        # TODO(synk): training-mode stochastic dropout / batch-stat BN not implemented.
        h = jnp.maximum(z, 0.0).astype(matmul_dtype)

    # Fused mu|logvar head (columns zero-padded to a lane-dense multiple of 128).
    w_ref = refs[idx]; idx += 1
    acc = jnp.dot(h, w_ref[...], preferred_element_type=jnp.float32)
    if inject_flags[num_hidden]:
        wc_ref = refs[idx]; idx += 1
        acc = acc + jnp.dot(cat, wc_ref[...], preferred_element_type=jnp.float32)
    b_ref = refs[idx]; idx += 1
    out_ref = refs[idx]
    out_ref[...] = acc + b_ref[...]


def encoder_forward(x, categs, params, latent_dim, *, inject_covariates=True,
                    block_batch=256, matmul_dtype=jnp.bfloat16):
    """Fused Pallas encoder forward. Returns (mu, logvar), eval-mode semantics."""
    B, in_features = x.shape
    num_hidden = len(params["layers"])
    use_cat = categs is not None and categs.shape[-1] > 0
    cat_dim = int(categs.shape[-1]) if use_cat else 0
    # Layer 0 always sees the covariates; later layers + heads only when injected.
    inject_flags = tuple([use_cat]
                         + [use_cat and inject_covariates] * (num_hidden - 1)
                         + [use_cat and inject_covariates])

    # ---- one-time wrapper-side folding / lane-padding of static weights ----
    cat_pad = _round_up(max(cat_dim, 8), 8) if use_cat else 0
    weights, cat_ws, scales, biases = [], [], [], []
    prev_pad = in_features
    for lp in params["layers"]:
        H = lp["W_main"].shape[1]
        Hpad = _round_up(max(H, 128), 128)               # lane-dense intermediates
        s = lp["gamma"] * jax.lax.rsqrt(lp["var"] + BN_EPS)          # (1, H)
        b = (lp["b"] - lp["mean"]) * s + lp["beta"]                  # (1, H)
        W = jnp.pad(lp["W_main"],
                    ((0, prev_pad - lp["W_main"].shape[0]), (0, Hpad - H)))
        weights.append(W.astype(matmul_dtype))
        if use_cat:
            cat_ws.append(jnp.pad(lp["W_cat"].astype(jnp.float32),
                                  ((0, cat_pad - lp["W_cat"].shape[0]), (0, Hpad - H))))
        else:
            cat_ws.append(None)
        scales.append(jnp.pad(s.astype(jnp.float32), ((0, 0), (0, Hpad - H))))
        biases.append(jnp.pad(b.astype(jnp.float32), ((0, 0), (0, Hpad - H))))
        prev_pad = Hpad

    head_n = 2 * latent_dim
    head_pad = _round_up(max(head_n, 128), 128)          # unmasked vst stores
    Wh = jnp.concatenate([params["mu"]["W_main"], params["logvar"]["W_main"]], axis=1)
    weights.append(jnp.pad(Wh, ((0, prev_pad - Wh.shape[0]),
                                (0, head_pad - head_n))).astype(matmul_dtype))
    if use_cat:
        Wch = jnp.concatenate([params["mu"]["W_cat"], params["logvar"]["W_cat"]], axis=1)
        cat_ws.append(jnp.pad(Wch.astype(jnp.float32),
                              ((0, cat_pad - Wch.shape[0]), (0, head_pad - head_n))))
    else:
        cat_ws.append(None)
    bh = jnp.concatenate([params["mu"]["b"], params["logvar"]["b"]], axis=1)
    biases.append(jnp.pad(bh.astype(jnp.float32), ((0, 0), (0, head_pad - head_n))))

    categs_p = (jnp.pad(categs.astype(jnp.float32), ((0, 0), (0, cat_pad - cat_dim)))
                if use_cat else None)

    # ---- batch tiling: >=2 grid steps when possible (megacore + pipelining) ----
    sub = 8
    tb_cap = int(min(block_batch, _round_up(B, sub)))
    tb = int(min(tb_cap, _round_up(-(-B // 2), sub))) if B > sub else tb_cap
    n_blocks = -(-B // tb)
    # NOTE: no explicit batch padding — a partial trailing block only produces
    # output rows outside [0, B) which are never read back (rows are independent).
    # TODO(synk): K-tile layer 0 (emit_pipeline over in_features) for very large F.

    batch_map = lambda i: (i, 0)
    resident_map = lambda i: (0, 0)

    def _build(single_buffer_weights):
        def res_spec(arr):
            if single_buffer_weights:
                # Resident params never change block index -> single-buffer them
                # (halves their VMEM footprint; matters most on v7x's 64 MiB / TC).
                return pl.BlockSpec(tuple(arr.shape), resident_map,
                                    pipeline_mode=pl.Buffered(1))
            return pl.BlockSpec(tuple(arr.shape), resident_map)

        ops = [x]
        in_specs = [pl.BlockSpec((tb, in_features), batch_map)]
        if use_cat:
            ops.append(categs_p)
            in_specs.append(pl.BlockSpec((tb, cat_pad), batch_map))
        for l in range(num_hidden):
            ops.append(weights[l]); in_specs.append(res_spec(weights[l]))
            if inject_flags[l]:
                ops.append(cat_ws[l]); in_specs.append(res_spec(cat_ws[l]))
            ops.append(scales[l]); in_specs.append(res_spec(scales[l]))
            ops.append(biases[l]); in_specs.append(res_spec(biases[l]))
        ops.append(weights[num_hidden]); in_specs.append(res_spec(weights[num_hidden]))
        if inject_flags[num_hidden]:
            ops.append(cat_ws[num_hidden]); in_specs.append(res_spec(cat_ws[num_hidden]))
        ops.append(biases[num_hidden]); in_specs.append(res_spec(biases[num_hidden]))
        out_specs = pl.BlockSpec((tb, head_pad), batch_map)
        return ops, in_specs, out_specs

    # ---- explicit scoped-VMEM budget + scheduler cost hint ----
    resident_bytes = (sum(int(w.nbytes) for w in weights)
                      + sum(int(cw.nbytes) for f, cw in zip(inject_flags, cat_ws) if f)
                      + sum(int(s.nbytes) for s in scales)
                      + sum(int(b.nbytes) for b in biases))
    tile_bytes = tb * 4 * (in_features + (cat_pad if use_cat else 0) + head_pad)
    max_w = max(int(w.shape[1]) for w in weights)
    vmem_need = (2 * resident_bytes        # conservative: x2 if single-buffer unsupported
                 + 2 * tile_bytes          # double-buffered row tiles (x, categs, out)
                 + 4 * tb * max_w * 4)     # slack for live activations / accumulators
    vmem_limit = int(min(max(vmem_need + (4 << 20), 32 << 20), 96 << 20))

    flops = 0
    for l in range(num_hidden + 1):
        flops += 2 * B * int(weights[l].shape[0]) * int(weights[l].shape[1])
        if inject_flags[l]:
            flops += 2 * B * int(cat_ws[l].shape[0]) * int(cat_ws[l].shape[1])
    bytes_accessed = (int(x.nbytes) + resident_bytes + B * head_pad * 4
                      + (int(categs_p.nbytes) if use_cat else 0))
    cost = pl.CostEstimate(flops=flops, transcendentals=0,
                           bytes_accessed=int(bytes_accessed))

    kernel = functools.partial(_encoder_kernel, num_hidden, inject_flags, matmul_dtype)

    def _invoke(single_buffer_weights):
        ops, in_specs, out_specs = _build(single_buffer_weights)
        return pl.pallas_call(
            kernel,
            out_shape=jax.ShapeDtypeStruct((B, head_pad), jnp.float32),
            grid_spec=pltpu.PrefetchScalarGridSpec(
                num_scalar_prefetch=0,
                grid=(n_blocks,),
                in_specs=in_specs,
                out_specs=out_specs,
            ),
            compiler_params=pltpu.CompilerParams(
                dimension_semantics=("parallel",),
                vmem_limit_bytes=vmem_limit),
            cost_estimate=cost,
        )(*ops)

    try:
        out = _invoke(True)
    except Exception:
        # Compatibility fallback for jax versions where BlockSpec.pipeline_mode /
        # pl.Buffered(1) is not supported for top-level pallas_call pipelining.
        out = _invoke(False)

    mu = out[:, :latent_dim]
    logvar = out[:, latent_dim:head_n]
    return mu, logvar


def _reference(x, categs, params):
    """Pure-JAX f32 reference (un-folded math, eval-mode PyTorch semantics)."""
    h = x
    for lp in params["layers"]:
        z = h @ lp["W_main"] + categs @ lp["W_cat"] + lp["b"]
        z = lp["gamma"] * (z - lp["mean"]) / jnp.sqrt(lp["var"] + BN_EPS) + lp["beta"]
        h = jnp.maximum(z, 0.0)
    mu = h @ params["mu"]["W_main"] + categs @ params["mu"]["W_cat"] + params["mu"]["b"]
    lv = h @ params["logvar"]["W_main"] + categs @ params["logvar"]["W_cat"] + params["logvar"]["b"]
    return mu, lv


def _init_params(key, in_features, cat_dim, hidden_layers, neurons_per_layer, latent_dim):
    """Deterministic synthetic parameter init matching the module's shapes."""
    params = {"layers": []}
    prev = in_features
    for _ in range(hidden_layers):
        key, k1, k2, k3, k4, k5, k6, k7 = jax.random.split(key, 8)
        H = neurons_per_layer
        params["layers"].append({
            "W_main": 0.05 * jax.random.normal(k1, (prev, H), jnp.float32),
            "W_cat":  0.05 * jax.random.normal(k2, (cat_dim, H), jnp.float32),
            "b":      0.05 * jax.random.normal(k3, (1, H), jnp.float32),
            "gamma":  1.0 + 0.1 * jax.random.normal(k4, (1, H), jnp.float32),
            "beta":   0.1 * jax.random.normal(k5, (1, H), jnp.float32),
            "mean":   0.1 * jax.random.normal(k6, (1, H), jnp.float32),
            "var":    1.0 + 0.1 * jnp.abs(jax.random.normal(k7, (1, H), jnp.float32)),
        })
        prev = H
    for head in ("mu", "logvar"):
        key, k1, k2, k3 = jax.random.split(key, 4)
        params[head] = {
            "W_main": 0.05 * jax.random.normal(k1, (prev, latent_dim), jnp.float32),
            "W_cat":  0.05 * jax.random.normal(k2, (cat_dim, latent_dim), jnp.float32),
            "b":      0.05 * jax.random.normal(k3, (1, latent_dim), jnp.float32),
        }
    return params


if __name__ == "__main__":
    # Small, module-consistent shapes.
    B = 8
    in_features = 32
    n_cat_list = [3, 2]           # -> cat_dim = 5
    hidden_layers = 2
    neurons_per_layer = 64
    latent_dim = 16
    cat_dim = sum(n_cat_list)

    key = jax.random.PRNGKey(0)
    key, kx, kc1, kc2, kp = jax.random.split(key, 5)

    x = jax.random.normal(kx, (B, in_features), jnp.float32)
    cat1 = jax.random.randint(kc1, (B,), 0, n_cat_list[0])
    cat2 = jax.random.randint(kc2, (B,), 0, n_cat_list[1])
    # one-hot + hstack (glue, as in the PyTorch forward)
    categs = jnp.concatenate(
        [jax.nn.one_hot(cat1, n_cat_list[0], dtype=jnp.float32),
         jax.nn.one_hot(cat2, n_cat_list[1], dtype=jnp.float32)],
        axis=-1,
    )

    params = _init_params(kp, in_features, cat_dim, hidden_layers,
                          neurons_per_layer, latent_dim)

    mu, logvar = encoder_forward(x, categs, params, latent_dim)
    jax.block_until_ready((mu, logvar))

    mu_ref, lv_ref = _reference(x, categs, params)
    assert mu.shape == (B, latent_dim) and logvar.shape == (B, latent_dim)
    # Tolerance accounts for bf16 matmul inputs (f32 accumulation / f32 epilogue).
    np.testing.assert_allclose(np.asarray(mu), np.asarray(mu_ref), rtol=2e-2, atol=2e-2)
    np.testing.assert_allclose(np.asarray(logvar), np.asarray(lv_ref), rtol=2e-2, atol=2e-2)

    print("KERNEL_OK")
</pallas_src>

<mosaic_0001>
module attributes {stable_mosaic.version = 11 : i64} {
  func.func @_encoder_kernel(%arg0: i32, %arg1: memref<8x32xf32, #tpu.memory_space<vmem>>, %arg2: memref<8x8xf32, #tpu.memory_space<vmem>>, %arg3: memref<32x128xbf16, #tpu.memory_space<vmem>>, %arg4: memref<8x128xf32, #tpu.memory_space<vmem>>, %arg5: memref<1x128xf32, #tpu.memory_space<vmem>>, %arg6: memref<1x128xf32, #tpu.memory_space<vmem>>, %arg7: memref<128x128xbf16, #tpu.memory_space<vmem>>, %arg8: memref<8x128xf32, #tpu.memory_space<vmem>>, %arg9: memref<1x128xf32, #tpu.memory_space<vmem>>, %arg10: memref<1x128xf32, #tpu.memory_space<vmem>>, %arg11: memref<128x128xbf16, #tpu.memory_space<vmem>>, %arg12: memref<8x128xf32, #tpu.memory_space<vmem>>, %arg13: memref<1x128xf32, #tpu.memory_space<vmem>>, %arg14: memref<8x128xf32, #tpu.memory_space<vmem>>) attributes {dimension_semantics = [#tpu.dimension_semantics<parallel>], iteration_bounds = array<i64: 1>, scalar_prefetch = 0 : i64, scratch_operands = 0 : i64, tpu.core_type = #tpu.core_type<tc>, window_params = [{transform_indices = @transform_0, window_bounds = array<i64: 8, 32>}, {transform_indices = @transform_1, window_bounds = array<i64: 8, 8>}, {pipeline_mode = #tpu.pipeline_mode<synchronous>, transform_indices = @transform_2, window_bounds = array<i64: 32, 128>}, {pipeline_mode = #tpu.pipeline_mode<synchronous>, transform_indices = @transform_3, window_bounds = array<i64: 8, 128>}, {pipeline_mode = #tpu.pipeline_mode<synchronous>, transform_indices = @transform_4, window_bounds = array<i64: 1, 128>}, {pipeline_mode = #tpu.pipeline_mode<synchronous>, transform_indices = @transform_5, window_bounds = array<i64: 1, 128>}, {pipeline_mode = #tpu.pipeline_mode<synchronous>, transform_indices = @transform_6, window_bounds = array<i64: 128, 128>}, {pipeline_mode = #tpu.pipeline_mode<synchronous>, transform_indices = @transform_7, window_bounds = array<i64: 8, 128>}, {pipeline_mode = #tpu.pipeline_mode<synchronous>, transform_indices = @transform_8, window_bounds = array<i64: 1, 128>}, {pipeline_mode = #tpu.pipeline_mode<synchronous>, transform_indices = @transform_9, window_bounds = array<i64: 1, 128>}, {pipeline_mode = #tpu.pipeline_mode<synchronous>, transform_indices = @transform_10, window_bounds = array<i64: 128, 128>}, {pipeline_mode = #tpu.pipeline_mode<synchronous>, transform_indices = @transform_11, window_bounds = array<i64: 8, 128>}, {pipeline_mode = #tpu.pipeline_mode<synchronous>, transform_indices = @transform_12, window_bounds = array<i64: 1, 128>}, {transform_indices = @transform_13, window_bounds = array<i64: 8, 128>}]} {
    %c0 = arith.constant 0 : index
    %c0_0 = arith.constant 0 : index
    %0 = vector.load %arg2[%c0, %c0_0] : memref<8x8xf32, #tpu.memory_space<vmem>>, vector<8x8xf32>
    %c0_1 = arith.constant 0 : index
    %c0_2 = arith.constant 0 : index
    %1 = vector.load %arg1[%c0_1, %c0_2] : memref<8x32xf32, #tpu.memory_space<vmem>>, vector<8x32xf32>
    %2 = arith.truncf %1 : vector<8x32xf32> to vector<8x32xbf16>
    %c0_3 = arith.constant 0 : index
    %c0_4 = arith.constant 0 : index
    %3 = vector.load %arg3[%c0_3, %c0_4] : memref<32x128xbf16, #tpu.memory_space<vmem>>, vector<32x128xbf16>
    %cst = arith.constant dense<0.000000e+00> : vector<8x128xf32>
    %4 = tpu.matmul %2, %3, %cst {dimension_numbers = #tpu.dot_dimension_numbers<[1], [0], [0], [1], [0, 0, 1, 1], [], []>} : vector<8x32xbf16>, vector<32x128xbf16>, vector<8x128xf32> -> vector<8x128xf32>
    %c0_5 = arith.constant 0 : index
    %c0_6 = arith.constant 0 : index
    %5 = vector.load %arg4[%c0_5, %c0_6] : memref<8x128xf32, #tpu.memory_space<vmem>>, vector<8x128xf32>
    %cst_7 = arith.constant dense<0.000000e+00> : vector<8x128xf32>
    %6 = tpu.matmul %0, %5, %cst_7 {dimension_numbers = #tpu.dot_dimension_numbers<[1], [0], [0], [1], [0, 0, 1, 1], [], []>} : vector<8x8xf32>, vector<8x128xf32>, vector<8x128xf32> -> vector<8x128xf32>
    %7 = arith.addf %4, %6 : vector<8x128xf32>
    %c0_8 = arith.constant 0 : index
    %c0_9 = arith.constant 0 : index
    %8 = vector.load %arg5[%c0_8, %c0_9] : memref<1x128xf32, #tpu.memory_space<vmem>>, vector<1x128xf32>
    %9 = vector.broadcast %8 : vector<1x128xf32> to vector<8x128xf32>
    %10 = arith.mulf %7, %9 : vector<8x128xf32>
    %c0_10 = arith.constant 0 : index
    %c0_11 = arith.constant 0 : index
    %11 = vector.load %arg6[%c0_10, %c0_11] : memref<1x128xf32, #tpu.memory_space<vmem>>, vector<1x128xf32>
    %12 = vector.broadcast %11 : vector<1x128xf32> to vector<8x128xf32>
    %13 = arith.addf %10, %12 : vector<8x128xf32>
    %cst_12 = arith.constant 0.000000e+00 : f32
    %14 = vector.broadcast %cst_12 : f32 to vector<8x128xf32>
    %15 = arith.maximumf %13, %14 : vector<8x128xf32>
    %16 = arith.truncf %15 : vector<8x128xf32> to vector<8x128xbf16>
    %c0_13 = arith.constant 0 : index
    %c0_14 = arith.constant 0 : index
    %17 = vector.load %arg7[%c0_13, %c0_14] : memref<128x128xbf16, #tpu.memory_space<vmem>>, vector<128x128xbf16>
    %cst_15 = arith.constant dense<0.000000e+00> : vector<8x128xf32>
    %18 = tpu.matmul %16, %17, %cst_15 {dimension_numbers = #tpu.dot_dimension_numbers<[1], [0], [0], [1], [0, 0, 1, 1], [], []>} : vector<8x128xbf16>, vector<128x128xbf16>, vector<8x128xf32> -> vector<8x128xf32>
    %c0_16 = arith.constant 0 : index
    %c0_17 = arith.constant 0 : index
    %19 = vector.load %arg8[%c0_16, %c0_17] : memref<8x128xf32, #tpu.memory_space<vmem>>, vector<8x128xf32>
    %cst_18 = arith.constant dense<0.000000e+00> : vector<8x128xf32>
    %20 = tpu.matmul %0, %19, %cst_18 {dimension_numbers = #tpu.dot_dimension_numbers<[1], [0], [0], [1], [0, 0, 1, 1], [], []>} : vector<8x8xf32>, vector<8x128xf32>, vector<8x128xf32> -> vector<8x128xf32>
    %21 = arith.addf %18, %20 : vector<8x128xf32>
    %c0_19 = arith.constant 0 : index
    %c0_20 = arith.constant 0 : index
    %22 = vector.load %arg9[%c0_19, %c0_20] : memref<1x128xf32, #tpu.memory_space<vmem>>, vector<1x128xf32>
    %23 = vector.broadcast %22 : vector<1x128xf32> to vector<8x128xf32>
    %24 = arith.mulf %21, %23 : vector<8x128xf32>
    %c0_21 = arith.constant 0 : index
    %c0_22 = arith.constant 0 : index
    %25 = vector.load %arg10[%c0_21, %c0_22] : memref<1x128xf32, #tpu.memory_space<vmem>>, vector<1x128xf32>
    %26 = vector.broadcast %25 : vector<1x128xf32> to vector<8x128xf32>
    %27 = arith.addf %24, %26 : vector<8x128xf32>
    %cst_23 = arith.constant 0.000000e+00 : f32
    %28 = vector.broadcast %cst_23 : f32 to vector<8x128xf32>
    %29 = arith.maximumf %27, %28 : vector<8x128xf32>
    %30 = arith.truncf %29 : vector<8x128xf32> to vector<8x128xbf16>
    %c0_24 = arith.constant 0 : index
    %c0_25 = arith.constant 0 : index
    %31 = vector.load %arg11[%c0_24, %c0_25] : memref<128x128xbf16, #tpu.memory_space<vmem>>, vector<128x128xbf16>
    %cst_26 = arith.constant dense<0.000000e+00> : vector<8x128xf32>
    %32 = tpu.matmul %30, %31, %cst_26 {dimension_numbers = #tpu.dot_dimension_numbers<[1], [0], [0], [1], [0, 0, 1, 1], [], []>} : vector<8x128xbf16>, vector<128x128xbf16>, vector<8x128xf32> -> vector<8x128xf32>
    %c0_27 = arith.constant 0 : index
    %c0_28 = arith.constant 0 : index
    %33 = vector.load %arg12[%c0_27, %c0_28] : memref<8x128xf32, #tpu.memory_space<vmem>>, vector<8x128xf32>
    %cst_29 = arith.constant dense<0.000000e+00> : vector<8x128xf32>
    %34 = tpu.matmul %0, %33, %cst_29 {dimension_numbers = #tpu.dot_dimension_numbers<[1], [0], [0], [1], [0, 0, 1, 1], [], []>} : vector<8x8xf32>, vector<8x128xf32>, vector<8x128xf32> -> vector<8x128xf32>
    %35 = arith.addf %32, %34 : vector<8x128xf32>
    %c0_30 = arith.constant 0 : index
    %c0_31 = arith.constant 0 : index
    %36 = vector.load %arg13[%c0_30, %c0_31] : memref<1x128xf32, #tpu.memory_space<vmem>>, vector<1x128xf32>
    %37 = vector.broadcast %36 : vector<1x128xf32> to vector<8x128xf32>
    %38 = arith.addf %35, %37 : vector<8x128xf32>
    %c0_32 = arith.constant 0 : index
    %c0_33 = arith.constant 0 : index
    %39 = vector.load %arg14[%c0_32, %c0_33] : memref<8x128xf32, #tpu.memory_space<vmem>>, vector<8x128xf32>
    tpu.vector_store %arg14[%c0_32, %c0_33], %38 {strides = array<i32>} : memref<8x128xf32, #tpu.memory_space<vmem>>, vector<8x128xf32>,
    return
  }
  func.func @transform_0(%arg0: i32) -> (i32, i32) {
    %c0_i32 = arith.constant 0 : i32
    %c0_i32_0 = arith.constant 0 : i32
    return %arg0, %c0_i32 : i32, i32
  }
  func.func @transform_1(%arg0: i32) -> (i32, i32) {
    %c0_i32 = arith.constant 0 : i32
    %c0_i32_0 = arith.constant 0 : i32
    return %arg0, %c0_i32 : i32, i32
  }
  func.func @transform_2(%arg0: i32) -> (i32, i32) {
    %c0_i32 = arith.constant 0 : i32
    %c0_i32_0 = arith.constant 0 : i32
    %c0_i32_1 = arith.constant 0 : i32
    return %c0_i32, %c0_i32_0 : i32, i32
  }
  func.func @transform_3(%arg0: i32) -> (i32, i32) {
    %c0_i32 = arith.constant 0 : i32
    %c0_i32_0 = arith.constant 0 : i32
    %c0_i32_1 = arith.constant 0 : i32
    return %c0_i32, %c0_i32_0 : i32, i32
  }
  func.func @transform_4(%arg0: i32) -> (i32, i32) {
    %c0_i32 = arith.constant 0 : i32
    %c0_i32_0 = arith.constant 0 : i32
    %c0_i32_1 = arith.constant 0 : i32
    return %c0_i32, %c0_i32_0 : i32, i32
  }
  func.func @transform_5(%arg0: i32) -> (i32, i32) {
    %c0_i32 = arith.constant 0 : i32
    %c0_i32_0 = arith.constant 0 : i32
    %c0_i32_1 = arith.constant 0 : i32
    return %c0_i32, %c0_i32_0 : i32, i32
  }
  func.func @transform_6(%arg0: i32) -> (i32, i32) {
    %c0_i32 = arith.constant 0 : i32
    %c0_i32_0 = arith.constant 0 : i32
    %c0_i32_1 = arith.constant 0 : i32
    return %c0_i32, %c0_i32_0 : i32, i32
  }
  func.func @transform_7(%arg0: i32) -> (i32, i32) {
    %c0_i32 = arith.constant 0 : i32
    %c0_i32_0 = arith.constant 0 : i32
    %c0_i32_1 = arith.constant 0 : i32
    return %c0_i32, %c0_i32_0 : i32, i32
  }
  func.func @transform_8(%arg0: i32) -> (i32, i32) {
    %c0_i32 = arith.constant 0 : i32
    %c0_i32_0 = arith.constant 0 : i32
    %c0_i32_1 = arith.constant 0 : i32
    return %c0_i32, %c0_i32_0 : i32, i32
  }
  func.func @transform_9(%arg0: i32) -> (i32, i32) {
    %c0_i32 = arith.constant 0 : i32
    %c0_i32_0 = arith.constant 0 : i32
    %c0_i32_1 = arith.constant 0 : i32
    return %c0_i32, %c0_i32_0 : i32, i32
  }
  func.func @transform_10(%arg0: i32) -> (i32, i32) {
    %c0_i32 = arith.constant 0 : i32
    %c0_i32_0 = arith.constant 0 : i32
    %c0_i32_1 = arith.constant 0 : i32
    return %c0_i32, %c0_i32_0 : i32, i32
  }
  func.func @transform_11(%arg0: i32) -> (i32, i32) {
    %c0_i32 = arith.constant 0 : i32
    %c0_i32_0 = arith.constant 0 : i32
    %c0_i32_1 = arith.constant 0 : i32
    return %c0_i32, %c0_i32_0 : i32, i32
  }
  func.func @transform_12(%arg0: i32) -> (i32, i32) {
    %c0_i32 = arith.constant 0 : i32
    %c0_i32_0 = arith.constant 0 : i32
    %c0_i32_1 = arith.constant 0 : i32
    return %c0_i32, %c0_i32_0 : i32, i32
  }
  func.func @transform_13(%arg0: i32) -> (i32, i32) {
    %c0_i32 = arith.constant 0 : i32
    %c0_i32_0 = arith.constant 0 : i32
    return %arg0, %c0_i32 : i32, i32
  }
}

module attributes {stable_mosaic.version = 11 : i64} {
  func.func @_encoder_kernel(%arg0: i32, %arg1: memref<8x32xf32, #tpu.memory_space<vmem>>, %arg2: memref<8x8xf32, #tpu.memory_space<vmem>>, %arg3: memref<32x128xbf16, #tpu.memory_space<vmem>>, %arg4: memref<8x128xf32, #tpu.memory_space<vmem>>, %arg5: memref<1x128xf32, #tpu.memory_space<vmem>>, %arg6: memref<1x128xf32, #tpu.memory_space<vmem>>, %arg7: memref<128x128xbf16, #tpu.memory_space<vmem>>, %arg8: memref<8x128xf32, #tpu.memory_space<vmem>>, %arg9: memref<1x128xf32, #tpu.memory_space<vmem>>, %arg10: memref<1x128xf32, #tpu.memory_space<vmem>>, %arg11: memref<128x128xbf16, #tpu.memory_space<vmem>>, %arg12: memref<8x128xf32, #tpu.memory_space<vmem>>, %arg13: memref<1x128xf32, #tpu.memory_space<vmem>>, %arg14: memref<8x128xf32, #tpu.memory_space<vmem>>) attributes {dimension_semantics = [#tpu.dimension_semantics<parallel>], iteration_bounds = array<i64: 1>, scalar_prefetch = 0 : i64, scratch_operands = 0 : i64, tpu.core_type = #tpu.core_type<tc>, window_params = [{transform_indices = @transform_0, window_bounds = array<i64: 8, 32>}, {transform_indices = @transform_1, window_bounds = array<i64: 8, 8>}, {pipeline_mode = #tpu.pipeline_mode<synchronous>, transform_indices = @transform_2, window_bounds = array<i64: 32, 128>}, {pipeline_mode = #tpu.pipeline_mode<synchronous>, transform_indices = @transform_3, window_bounds = array<i64: 8, 128>}, {pipeline_mode = #tpu.pipeline_mode<synchronous>, transform_indices = @transform_4, window_bounds = array<i64: 1, 128>}, {pipeline_mode = #tpu.pipeline_mode<synchronous>, transform_indices = @transform_5, window_bounds = array<i64: 1, 128>}, {pipeline_mode = #tpu.pipeline_mode<synchronous>, transform_indices = @transform_6, window_bounds = array<i64: 128, 128>}, {pipeline_mode = #tpu.pipeline_mode<synchronous>, transform_indices = @transform_7, window_bounds = array<i64: 8, 128>}, {pipeline_mode = #tpu.pipeline_mode<synchronous>, transform_indices = @transform_8, window_bounds = array<i64: 1, 128>}, {pipeline_mode = #tpu.pipeline_mode<synchronous>, transform_indices = @transform_9, window_bounds = array<i64: 1, 128>}, {pipeline_mode = #tpu.pipeline_mode<synchronous>, transform_indices = @transform_10, window_bounds = array<i64: 128, 128>}, {pipeline_mode = #tpu.pipeline_mode<synchronous>, transform_indices = @transform_11, window_bounds = array<i64: 8, 128>}, {pipeline_mode = #tpu.pipeline_mode<synchronous>, transform_indices = @transform_12, window_bounds = array<i64: 1, 128>}, {transform_indices = @transform_13, window_bounds = array<i64: 8, 128>}]} {
    %c0 = arith.constant 0 : index
    %c0_0 = arith.constant 0 : index
    %0 = vector.load %arg2[%c0, %c0_0] : memref<8x8xf32, #tpu.memory_space<vmem>>, vector<8x8xf32>
    %c0_1 = arith.constant 0 : index
    %c0_2 = arith.constant 0 : index
    %1 = vector.load %arg1[%c0_1, %c0_2] : memref<8x32xf32, #tpu.memory_space<vmem>>, vector<8x32xf32>
    %2 = arith.truncf %1 : vector<8x32xf32> to vector<8x32xbf16>
    %c0_3 = arith.constant 0 : index
    %c0_4 = arith.constant 0 : index
    %3 = vector.load %arg3[%c0_3, %c0_4] : memref<32x128xbf16, #tpu.memory_space<vmem>>, vector<32x128xbf16>
    %cst = arith.constant dense<0.000000e+00> : vector<8x128xf32>
    %4 = tpu.matmul %2, %3, %cst {dimension_numbers = #tpu.dot_dimension_numbers<[1], [0], [0], [1], [0, 0, 1, 1], [], []>} : vector<8x32xbf16>, vector<32x128xbf16>, vector<8x128xf32> -> vector<8x128xf32>
    %c0_5 = arith.constant 0 : index
    %c0_6 = arith.constant 0 : index
    %5 = vector.load %arg4[%c0_5, %c0_6] : memref<8x128xf32, #tpu.memory_space<vmem>>, vector<8x128xf32>
    %cst_7 = arith.constant dense<0.000000e+00> : vector<8x128xf32>
    %6 = tpu.matmul %0, %5, %cst_7 {dimension_numbers = #tpu.dot_dimension_numbers<[1], [0], [0], [1], [0, 0, 1, 1], [], []>} : vector<8x8xf32>, vector<8x128xf32>, vector<8x128xf32> -> vector<8x128xf32>
    %7 = arith.addf %4, %6 : vector<8x128xf32>
    %c0_8 = arith.constant 0 : index
    %c0_9 = arith.constant 0 : index
    %8 = vector.load %arg5[%c0_8, %c0_9] : memref<1x128xf32, #tpu.memory_space<vmem>>, vector<1x128xf32>
    %9 = vector.broadcast %8 : vector<1x128xf32> to vector<8x128xf32>
    %10 = arith.mulf %7, %9 : vector<8x128xf32>
    %c0_10 = arith.constant 0 : index
    %c0_11 = arith.constant 0 : index
    %11 = vector.load %arg6[%c0_10, %c0_11] : memref<1x128xf32, #tpu.memory_space<vmem>>, vector<1x128xf32>
    %12 = vector.broadcast %11 : vector<1x128xf32> to vector<8x128xf32>
    %13 = arith.addf %10, %12 : vector<8x128xf32>
    %cst_12 = arith.constant 0.000000e+00 : f32
    %14 = vector.broadcast %cst_12 : f32 to vector<8x128xf32>
    %15 = arith.maximumf %13, %14 : vector<8x128xf32>
    %16 = arith.truncf %15 : vector<8x128xf32> to vector<8x128xbf16>
    %c0_13 = arith.constant 0 : index
    %c0_14 = arith.constant 0 : index
    %17 = vector.load %arg7[%c0_13, %c0_14] : memref<128x128xbf16, #tpu.memory_space<vmem>>, vector<128x128xbf16>
    %cst_15 = arith.constant dense<0.000000e+00> : vector<8x128xf32>
    %18 = tpu.matmul %16, %17, %cst_15 {dimension_numbers = #tpu.dot_dimension_numbers<[1], [0], [0], [1], [0, 0, 1, 1], [], []>} : vector<8x128xbf16>, vector<128x128xbf16>, vector<8x128xf32> -> vector<8x128xf32>
    %c0_16 = arith.constant 0 : index
    %c0_17 = arith.constant 0 : index
    %19 = vector.load %arg8[%c0_16, %c0_17] : memref<8x128xf32, #tpu.memory_space<vmem>>, vector<8x128xf32>
    %cst_18 = arith.constant dense<0.000000e+00> : vector<8x128xf32>
    %20 = tpu.matmul %0, %19, %cst_18 {dimension_numbers = #tpu.dot_dimension_numbers<[1], [0], [0], [1], [0, 0, 1, 1], [], []>} : vector<8x8xf32>, vector<8x128xf32>, vector<8x128xf32> -> vector<8x128xf32>
    %21 = arith.addf %18, %20 : vector<8x128xf32>
    %c0_19 = arith.constant 0 : index
    %c0_20 = arith.constant 0 : index
    %22 = vector.load %arg9[%c0_19, %c0_20] : memref<1x128xf32, #tpu.memory_space<vmem>>, vector<1x128xf32>
    %23 = vector.broadcast %22 : vector<1x128xf32> to vector<8x128xf32>
    %24 = arith.mulf %21, %23 : vector<8x128xf32>
    %c0_21 = arith.constant 0 : index
    %c0_22 = arith.constant 0 : index
    %25 = vector.load %arg10[%c0_21, %c0_22] : memref<1x128xf32, #tpu.memory_space<vmem>>, vector<1x128xf32>
    %26 = vector.broadcast %25 : vector<1x128xf32> to vector<8x128xf32>
    %27 = arith.addf %24, %26 : vector<8x128xf32>
    %cst_23 = arith.constant 0.000000e+00 : f32
    %28 = vector.broadcast %cst_23 : f32 to vector<8x128xf32>
    %29 = arith.maximumf %27, %28 : vector<8x128xf32>
    %30 = arith.truncf %29 : vector<8x128xf32> to vector<8x128xbf16>
    %c0_24 = arith.constant 0 : index
    %c0_25 = arith.constant 0 : index
    %31 = vector.load %arg11[%c0_24, %c0_25] : memref<128x128xbf16, #tpu.memory_space<vmem>>, vector<128x128xbf16>
    %cst_26 = arith.constant dense<0.000000e+00> : vector<8x128xf32>
    %32 = tpu.matmul %30, %31, %cst_26 {dimension_numbers = #tpu.dot_dimension_numbers<[1], [0], [0], [1], [0, 0, 1, 1], [], []>} : vector<8x128xbf16>, vector<128x128xbf16>, vector<8x128xf32> -> vector<8x128xf32>
    %c0_27 = arith.constant 0 : index
    %c0_28 = arith.constant 0 : index
    %33 = vector.load %arg12[%c0_27, %c0_28] : memref<8x128xf32, #tpu.memory_space<vmem>>, vector<8x128xf32>
    %cst_29 = arith.constant dense<0.000000e+00> : vector<8x128xf32>
    %34 = tpu.matmul %0, %33, %cst_29 {dimension_numbers = #tpu.dot_dimension_numbers<[1], [0], [0], [1], [0, 0, 1, 1], [], []>} : vector<8x8xf32>, vector<8x128xf32>, vector<8x128xf32> -> vector<8x128xf32>
    %35 = arith.addf %32, %34 : vector<8x128xf32>
    %c0_30 = arith.constant 0 : index
    %c0_31 = arith.constant 0 : index
    %36 = vector.load %arg13[%c0_30, %c0_31] : memref<1x128xf32, #tpu.memory_space<vmem>>, vector<1x128xf32>
    %37 = vector.broadcast %36 : vector<1x128xf32> to vector<8x128xf32>
    %38 = arith.addf %35, %37 : vector<8x128xf32>
    %c0_32 = arith.constant 0 : index
    %c0_33 = arith.constant 0 : index
    %39 = vector.load %arg14[%c0_32, %c0_33] : memref<8x128xf32, #tpu.memory_space<vmem>>, vector<8x128xf32>
    tpu.vector_store %arg14[%c0_32, %c0_33], %38 {strides = array<i32>} : memref<8x128xf32, #tpu.memory_space<vmem>>, vector<8x128xf32>,
    return
  }
  func.func @transform_0(%arg0: i32) -> (i32, i32) {
    %c0_i32 = arith.constant 0 : i32
    %c0_i32_0 = arith.constant 0 : i32
    return %arg0, %c0_i32 : i32, i32
  }
  func.func @transform_1(%arg0: i32) -> (i32, i32) {
    %c0_i32 = arith.constant 0 : i32
    %c0_i32_0 = arith.constant 0 : i32
    return %arg0, %c0_i32 : i32, i32
  }
  func.func @transform_2(%arg0: i32) -> (i32, i32) {
    %c0_i32 = arith.constant 0 : i32
    %c0_i32_0 = arith.constant 0 : i32
    %c0_i32_1 = arith.constant 0 : i32
    return %c0_i32, %c0_i32_0 : i32, i32
  }
  func.func @transform_3(%arg0: i32) -> (i32, i32) {
    %c0_i32 = arith.constant 0 : i32
    %c0_i32_0 = arith.constant 0 : i32
    %c0_i32_1 = arith.constant 0 : i32
    return %c0_i32, %c0_i32_0 : i32, i32
  }
  func.func @transform_4(%arg0: i32) -> (i32, i32) {
    %c0_i32 = arith.constant 0 : i32
    %c0_i32_0 = arith.constant 0 : i32
    %c0_i32_1 = arith.constant 0 : i32
    return %c0_i32, %c0_i32_0 : i32, i32
  }
  func.func @transform_5(%arg0: i32) -> (i32, i32) {
    %c0_i32 = arith.constant 0 : i32
    %c0_i32_0 = arith.constant 0 : i32
    %c0_i32_1 = arith.constant 0 : i32
    return %c0_i32, %c0_i32_0 : i32, i32
  }
  func.func @transform_6(%arg0: i32) -> (i32, i32) {
    %c0_i32 = arith.constant 0 : i32
    %c0_i32_0 = arith.constant 0 : i32
    %c0_i32_1 = arith.constant 0 : i32
    return %c0_i32, %c0_i32_0 : i32, i32
  }
  func.func @transform_7(%arg0: i32) -> (i32, i32) {
    %c0_i32 = arith.constant 0 : i32
    %c0_i32_0 = arith.constant 0 : i32
    %c0_i32_1 = arith.constant 0 : i32
    return %c0_i32, %c0_i32_0 : i32, i32
  }
  func.func @transform_8(%arg0: i32) -> (i32, i32) {
    %c0_i32 = arith.constant 0 : i32
    %c0_i32_0 = arith.constant 0 : i32
    %c0_i32_1 = arith.constant 0 : i32
    return %c0_i32, %c0_i32_0 : i32, i32
  }
  func.func @transform_9(%arg0: i32) -> (i32, i32) {
    %c0_i32 = arith.constant 0 : i32
    %c0_i32_0 = arith.constant 0 : i32
    %c0_i32_1 = arith.constant 0 : i32
    return %c0_i32, %c0_i32_0 : i32, i32
  }
  func.func @transform_10(%arg0: i32) -> (i32, i32) {
    %c0_i32 = arith.constant 0 : i32
    %c0_i32_0 = arith.constant 0 : i32
    %c0_i32_1 = arith.constant 0 : i32
    return %c0_i32, %c0_i32_0 : i32, i32
  }
  func.func @transform_11(%arg0: i32) -> (i32, i32) {
    %c0_i32 = arith.constant 0 : i32
    %c0_i32_0 = arith.constant 0 : i32
    %c0_i32_1 = arith.constant 0 : i32
    return %c0_i32, %c0_i32_0 : i32, i32
  }
  func.func @transform_12(%arg0: i32) -> (i32, i32) {
    %c0_i32 = arith.constant 0 : i32
    %c0_i32_0 = arith.constant 0 : i32
    %c0_i32_1 = arith.constant 0 : i32
    return %c0_i32, %c0_i32_0 : i32, i32
  }
  func.func @transform_13(%arg0: i32) -> (i32, i32) {
    %c0_i32 = arith.constant 0 : i32
    %c0_i32_0 = arith.constant 0 : i32
    return %arg0, %c0_i32 : i32, i32
  }
}

</mosaic_0001>

<bundles_post_ra>
// kernel: tpu_custom_call.1
= control target key start
LH: loop header
LB: loop body
LE: loop exit
PB: predicated region body
PF: predicated region fallthrough
CT: control target
= control target key end

     0   :  { %18 = vsyncpa [#allocation3], 0  ;;  %s1282_s0 = inlined_call_operand.hbm [shape: f32[8,32], index: 0, kind: input, shape index: {}]   ;;  %s1283_s1 = inlined_call_operand.hbm [shape: f32[8,8], index: 1, kind: input, shape index: {}]   ;;  %s1284_s2 = inlined_call_operand.hbm [shape: bf16[32,128], index: 2, kind: input, shape index: {}]   ;;  %s1285_s3 = inlined_call_operand.hbm [shape: f32[8,128], index: 3, kind: input, shape index: {}]   ;;  %s1286_s4 = inlined_call_operand.hbm [shape: f32[1,128], index: 4, kind: input, shape index: {}]   ;;  %s1287_s5 = inlined_call_operand.hbm [shape: f32[1,128], index: 5, kind: input, shape index: {}]   ;;  %s1288_s6 = inlined_call_operand.hbm [shape: bf16[128,128], index: 6, kind: input, shape index: {}]   ;;  %s1289_s7 = inlined_call_operand.vmem [shape: f32[8,128], index: 7, kind: input, shape index: {}]   ;;  %s1290_s8 = inlined_call_operand.hbm [shape: f32[1,128], index: 8, kind: input, shape index: {}]   ;;  %s1291_s9 = inlined_call_operand.hbm [shape: f32[1,128], index: 9, kind: input, shape index: {}]   ;;  %s1292_s10 = inlined_call_operand.hbm [shape: bf16[128,128], index: 10, kind: input, shape index: {}]   ;;  %s1293_s11 = inlined_call_operand.vmem [shape: f32[8,128], index: 11, kind: input, shape index: {}]   ;;  %s1294_s12 = inlined_call_operand.vmem [shape: f32[1,128], index: 12, kind: input, shape index: {}]   ;;  %s1295_s13 = inlined_call_operand.hbm [shape: f32[8,128], index: 13, kind: output, shape index: {}]  }
   0x1   :  { %19 = vsyncpa [#allocation6], 0 }
   0x2   :  { %20 = vsyncpa [#allocation9], 0 }
   0x3   :  { %21 = vsyncpa [#allocation12], 0 }
   0x4   :  { %22 = vsyncpa [#allocation15], 0 }
   0x5   :  { %23 = vsyncpa [#allocation18], 0 }
   0x6   :  { %24 = vsyncpa [#allocation4], 0  ;;  %s1105_s25 = smov [#allocation5]   ;;  %s1106_s27 = smov [#allocation8]  }
   0x7   :  { %s41_s26 = sshll.u32 %s1105_s25, 4  ;;  %s63_s28 = sshll.u32 %s1106_s27, 4  ;;  %s42_s26 = int_to_ptr.vmem [resolvable:$true] %s41_s26  ;;  %s64_s28 = int_to_ptr.vmem [resolvable:$true] %s63_s28 }
   0x8   :  { %s879_s29 = scalar_lea.vmem %s42_s26, 128  ;;  %p884_p1 = scmp.lt.s32.totalorder %s42_s26, %s42_s26 }
   0x9   :  { %p880_p0 = scmp.ne.s32.totalorder %s42_s26, %s879_s29  ;;  %p885_p2 = scmp.lt.s32.totalorder %s879_s29, %s879_s29 }
   0xb   :  { %p886_p3 = por %p885_p2, %p884_p1 }
   0xd   :  { %p887_p4 = pnand %p886_p3, %p880_p0 }
   0xf   :  { %890 = shalt.err (!%p887_p4)
}
  0x10   :  { %44 = dma.hbm_to_vmem [thread:$0]  %s1283_s1, 128, %s42_s26, [#allocation6]  }
  0x11   :  { %s899_s15 = scalar_lea.vmem %s64_s28, 128  ;;  %p904_p6 = scmp.lt.s32.totalorder %s64_s28, %s64_s28 }
  0x12   :  { %p900_p5 = scmp.ne.s32.totalorder %s64_s28, %s899_s15  ;;  %p905_p7 = scmp.lt.s32.totalorder %s899_s15, %s899_s15 }
  0x14   :  { %p906_p8 = por %p905_p7, %p904_p6 }
  0x16   :  { %p907_p9 = pnand %p906_p8, %p900_p5 }
  0x18   :  { %910 = shalt.err (!%p907_p9)
}
  0x19   :  { %66 = dma.hbm_to_vmem [thread:$0]  %s1285_s3, 128, %s64_s28, [#allocation9]  }
  0x1a   :  { %s1107_s18 = smov [#allocation11]   ;;  %s1108_s20 = smov [#allocation14]  }
  0x1b   :  { %s83_s19 = sshll.u32 %s1107_s18, 4  ;;  %s107_s21 = sshll.u32 %s1108_s20, 4  ;;  %s84_s19 = int_to_ptr.vmem [resolvable:$true] %s83_s19  ;;  %s108_s21 = int_to_ptr.vmem [resolvable:$true] %s107_s21 }
  0x1c   :  { %s919_s22 = scalar_lea.vmem %s84_s19, 16  ;;  %s923_s1 = scalar_lea.vmem %s84_s19, 32 }
  0x1d   :  { %p920_p10 = scmp.ne.s32.totalorder %s84_s19, %s919_s22  ;;  %p924_p11 = scmp.lt.s32.totalorder %s84_s19, %s84_s19 }
  0x1e   :  { %p925_p12 = scmp.lt.s32.totalorder %s923_s1, %s919_s22 }
  0x20   :  { %p926_p13 = por %p925_p12, %p924_p11 }
  0x22   :  { %p927_p0 = pnand %p926_p13, %p920_p10 }
  0x24   :  { %930 = shalt.err (!%p927_p0)
}
  0x25   :  { %86 = dma.hbm_to_vmem [thread:$0]  %s1287_s5, 16, %s84_s19, [#allocation12]  }
  0x26   :  { %s939_s25 = scalar_lea.vmem %s108_s21, 16  ;;  %s943_s3 = scalar_lea.vmem %s108_s21, 32 }
  0x27   :  { %p940_p1 = scmp.ne.s32.totalorder %s108_s21, %s939_s25  ;;  %p944_p2 = scmp.lt.s32.totalorder %s108_s21, %s108_s21 }
  0x28   :  { %p945_p3 = scmp.lt.s32.totalorder %s943_s3, %s939_s25 }
  0x2a   :  { %p946_p4 = por %p945_p3, %p944_p2 }
  0x2c   :  { %p947_p5 = pnand %p946_p4, %p940_p1 }
  0x2e   :  { %950 = shalt.err (!%p947_p5)
}
  0x2f   :  { %110 = dma.hbm_to_vmem [thread:$0]  %s1290_s8, 16, %s108_s21, [#allocation15]  }
  0x30   :  { %s1109_s28 = smov [#allocation2]   ;;  %s1110_s30 = smov [#allocation7]  }
  0x31   :  { %s31_s29 = sshll.u32 %s1109_s28, 4  ;;  %s50_s14 = sshll.u32 %s1110_s30, 4  ;;  %s32_s29 = int_to_ptr.vmem [resolvable:$true] %s31_s29  ;;  %s51_s14 = int_to_ptr.vmem [resolvable:$true] %s50_s14 }
  0x32   :  { %s959_s15 = scalar_lea.vmem %s32_s29, 128  ;;  %p964_p7 = scmp.lt.s32.totalorder %s32_s29, %s32_s29 }
  0x33   :  { %p960_p6 = scmp.ne.s32.totalorder %s32_s29, %s959_s15  ;;  %p965_p8 = scmp.lt.s32.totalorder %s959_s15, %s959_s15 }
  0x35   :  { %p966_p9 = por %p965_p8, %p964_p7 }
  0x37   :  { %p967_p10 = pnand %p966_p9, %p960_p6 }
  0x39   :  { %970 = shalt.err (!%p967_p10)
}
  0x3a   :  { %34 = dma.hbm_to_vmem [thread:$0]  %s1282_s0, 128, %s32_s29, [#allocation3]  }
  0x3b   :  { %s979_s17 = scalar_lea.vmem %s51_s14, 256  ;;  %p984_p12 = scmp.lt.s32.totalorder %s51_s14, %s51_s14 }
  0x3c   :  { %p980_p11 = scmp.ne.s32.totalorder %s51_s14, %s979_s17  ;;  %p985_p13 = scmp.lt.s32.totalorder %s979_s17, %s979_s17 }
  0x3e   :  { %p986_p0 = por %p985_p13, %p984_p12 }
  0x40   :  { %p987_p1 = pnand %p986_p0, %p980_p11 }
  0x42   :  { %990 = shalt.err (!%p987_p1)
}
  0x43   :  { %s1111_s8 = smov 64   ;;  %s1112_s18 = smov 4  }
  0x44   :  { %56 = dma.hbm_to_vmem [thread:$0]  %s1284_s2, 256, %s51_s14, [#allocation6], %s1111_s8, %s1111_s8, %s1112_s18  }
  0x45   :  { %s1113_s21 = smov [#allocation10]   ;;  %s1114_s1 = smov [#allocation13]  }
  0x46   :  { %s73_s22 = sshll.u32 %s1113_s21, 4  ;;  %s92_s0 = sshll.u32 %s1114_s1, 4  ;;  %s74_s22 = int_to_ptr.vmem [resolvable:$true] %s73_s22  ;;  %s93_s0 = int_to_ptr.vmem [resolvable:$true] %s92_s0 }
  0x47   :  { %s999_s23 = scalar_lea.vmem %s74_s22, 16  ;;  %s1003_s24 = scalar_lea.vmem %s74_s22, 32 }
  0x48   :  { %p1000_p2 = scmp.ne.s32.totalorder %s74_s22, %s999_s23  ;;  %p1004_p3 = scmp.lt.s32.totalorder %s74_s22, %s74_s22 }
  0x49   :  { %p1005_p4 = scmp.lt.s32.totalorder %s1003_s24, %s999_s23 }
  0x4b   :  { %p1006_p5 = por %p1005_p4, %p1004_p3 }
  0x4d   :  { %p1007_p6 = pnand %p1006_p5, %p1000_p2 }
  0x4f   :  { %1010 = shalt.err (!%p1007_p6)
}
  0x50   :  { %76 = dma.hbm_to_vmem [thread:$0]  %s1286_s4, 16, %s74_s22, [#allocation9]  }
  0x51   :  { %s1019_s26 = scalar_lea.vmem %s93_s0, 1024  ;;  %p1024_p8 = scmp.lt.s32.totalorder %s93_s0, %s93_s0 }
  0x52   :  { %p1020_p7 = scmp.ne.s32.totalorder %s93_s0, %s1019_s26  ;;  %p1025_p9 = scmp.lt.s32.totalorder %s1019_s26, %s1019_s26 }
  0x54   :  { %p1026_p10 = por %p1025_p9, %p1024_p8 }
  0x56   :  { %p1027_p11 = pnand %p1026_p10, %p1020_p7 }
  0x58   :  { %1030 = shalt.err (!%p1027_p11)
}
  0x59   :  { %98 = dma.hbm_to_vmem [thread:$0]  %s1288_s6, 1024, %s93_s0, [#allocation12], %s1111_s8, %s1111_s8, %s1112_s18  }
  0x5a   :  { %s1115_s28 = smov [#allocation16]   ;;  %s1116_s30 = smov [#allocation17]  }
  0x5b   :  { %s117_s29 = sshll.u32 %s1115_s28, 4  ;;  %s126_s14 = sshll.u32 %s1116_s30, 4  ;;  %s118_s29 = int_to_ptr.vmem [resolvable:$true] %s117_s29  ;;  %s127_s14 = int_to_ptr.vmem [resolvable:$true] %s126_s14 }
  0x5c   :  { %s1039_s4 = scalar_lea.vmem %s118_s29, 16  ;;  %s1043_s15 = scalar_lea.vmem %s118_s29, 32 }
  0x5d   :  { %p1040_p12 = scmp.ne.s32.totalorder %s118_s29, %s1039_s4  ;;  %p1044_p13 = scmp.lt.s32.totalorder %s118_s29, %s118_s29 }
  0x5e   :  { %p1045_p0 = scmp.lt.s32.totalorder %s1043_s15, %s1039_s4 }
  0x60   :  { %p1046_p1 = por %p1045_p0, %p1044_p13 }
  0x62   :  { %p1047_p2 = pnand %p1046_p1, %p1040_p12 }
  0x64   :  { %1050 = shalt.err (!%p1047_p2)
}
  0x65   :  { %120 = dma.hbm_to_vmem [thread:$0]  %s1291_s9, 16, %s118_s29, [#allocation15]  }
  0x66   :  { %s1059_s17 = scalar_lea.vmem %s127_s14, 1024  ;;  %p1064_p4 = scmp.lt.s32.totalorder %s127_s14, %s127_s14 }
  0x67   :  { %p1060_p3 = scmp.ne.s32.totalorder %s127_s14, %s1059_s17  ;;  %p1065_p5 = scmp.lt.s32.totalorder %s1059_s17, %s1059_s17 }
  0x69   :  { %p1066_p6 = por %p1065_p5, %p1064_p4 }
  0x6b   :  { %p1067_p7 = pnand %p1066_p6, %p1060_p3 }
  0x6d   :  { %1070 = shalt.err (!%p1067_p7)
}
  0x6e   :  { %132 = dma.hbm_to_vmem [thread:$0]  %s1292_s10, 1024, %s127_s14, [#allocation18], %s1111_s8, %s1111_s8, %s1112_s18  }
  0x6f   :  { %1091 = dma.done.wait [#allocation3], 128  }
  0x70   :  { %1092 = vsyncadd [#allocation3], 4294967168 }
  0x71   :  { %1093 = dma.done.wait [#allocation6], 384  }
  0x72   :  { %1094 = vsyncadd [#allocation6], 4294966912 }
  0x73   :  { %1095 = dma.done.wait [#allocation9], 144  }
  0x74   :  { %1096 = vsyncadd [#allocation9], 4294967152 }
  0x75   :  { %1097 = dma.done.wait [#allocation12], 1040  }
  0x76   :  { %1098 = vsyncadd [#allocation12], 4294966256 }
  0x77   :  { %1099 = dma.done.wait [#allocation15], 32  }
  0x78   :  { %1100 = vsyncadd [#allocation15], 4294967264 }
  0x79   :  { %1101 = dma.done.wait [#allocation18], 1024  }
  0x7a   :  { %1102 = vsyncadd [#allocation18], 4294966272  ;;  %v1117_v0 = vmov 0.0   ;;  %vm1118_vm0 = vmmov 0   ;;  %v853_v1 = vld [vmem:[#allocation7 + $0x8] sm:$0xff]   ;;  %vm176_vm1 = vcmask 64512  }
  0x7b   :  { %780 = vmatprep.subr.bf16.mxu1 %v1117_v0  ;;  %775 = vmatprep.subr.mxu0 %v1117_v0  ;;  %v175_v2 = vld [vmem:[#allocation8] sm:$0xff]  ;;  %v854_v3 = vld [vmem:[#allocation7] sm:$0xff]   ;;  %v1235_v4 = vld [vmem:[#allocation5] sm:$0xff]  ;;  %vm262_vm2 = vcmask 261120   ;;  %s1119_s20 = smov [#allocation19]  }
  0x7c   :  { %777 = vmatprep.mubr.msk.f32.mxu0 %vm1118_vm0, %v1117_v0  ;;  %784 = vmatprep.mubr.msk.bf16.mxu1 %vm1118_vm0, %v1117_v0  ;;  %v169_v5 = vld [vmem:[#allocation2] sm:$0xff]  ;;  %v857_v10 = vld [vmem:[#allocation13 + $0x28] sm:$0xff]   ;;  %v858_v11 = vld [vmem:[#allocation13 + $0x20] sm:$0xff]   ;;  %s707_s21 = sshll.u32 %s1119_s20, 4  ;;  %s708_s21 = int_to_ptr.vmem [resolvable:$true] %s707_s21 }
  0x7d   :  { %781 = vmatpush3.bf16.msra.mxu1 %v853_v1  ;;  %776 = vmatpush3.msra.mxu0 %v175_v2  ;;  %v340_v6 = vld [vmem:[%s1289_s7] sm:$0xff]  ;;  %v170_v8 = vpack.c.bf16 %v169_v5, %v169_v5  ;;  %v861_v14 = vld [vmem:[#allocation13 + $0x8] sm:$0xff]   ;;  %v862_v15 = vld [vmem:[#allocation13] sm:$0xff]   ;;  %s1071_s22 = scalar_lea.vmem %s708_s21, 128  ;;  %p1076_p9 = scmp.lt.s32.totalorder %s708_s21, %s708_s21 }
  0x7e   :  { %782 = vmatprep.subr.bf16.mxu1 %v1117_v0  ;;  %778 = vmatmul.mubr.msk.f32.vlgmr.msra.gmra.mxu0 %vm176_vm1, %v1235_v4  ;;  %v855_v7 = vld [vmem:[#allocation13 + $0x38] sm:$0xff]   ;;  %v856_v9 = vld [vmem:[#allocation13 + $0x30] sm:$0xff]   ;;  %v866_v19 = vld [vmem:[#allocation17 + $0x20] sm:$0xff]   ;;  %p1072_p8 = scmp.ne.s32.totalorder %s708_s21, %s1071_s22  ;;  %p1077_p10 = scmp.lt.s32.totalorder %s1071_s22, %s1071_s22 }
  0x7f   :  { %788 = vmatprep.subr.mxu0 %v1117_v0  ;;  %790 = vmatprep.mubr.msk.f32.mxu0 %vm1118_vm0, %v1117_v0  ;;  %v859_v12 = vld [vmem:[#allocation13 + $0x18] sm:$0xff]   ;;  %v860_v13 = vld [vmem:[#allocation13 + $0x10] sm:$0xff]   ;;  %v870_v38 = vld [vmem:[#allocation17] sm:$0xff]  }
  0x80   :  { %789 = vmatpush3.msra.mxu0 %v340_v6  ;;  %v863_v16 = vld [vmem:[#allocation17 + $0x38] sm:$0xff]   ;;  %v864_v17 = vld [vmem:[#allocation17 + $0x30] sm:$0xff]   ;;  %v865_v18 = vld [vmem:[#allocation17 + $0x28] sm:$0xff]   ;;  %p1078_p11 = por %p1077_p10, %p1076_p9 }
  0x81   :  { %783 = vmatpush3.bf16.msra.mxu1 %v854_v3  ;;  %793 = vmatprep.subr.bf16.mxu0 %v1117_v0  ;;  %v867_v20 = vld [vmem:[#allocation17 + $0x18] sm:$0xff]   ;;  %v868_v36 = vld [vmem:[#allocation17 + $0x10] sm:$0xff]   ;;  %v869_v37 = vld [vmem:[#allocation17 + $0x8] sm:$0xff]  }
  0x82   :  { %791 = vmatmul.mubr.msk.f32.vlgmr.msra.gmra.mxu0 %vm176_vm1, %v1235_v4  ;;  %818 = vmatprep.subr.bf16.mxu1 %v1117_v0  ;;  %v725_v25 = vld [vmem:[#allocation10] ss:$0 sm:$0xff]  ;;  %v726_v28 = vld [vmem:[#allocation11] ss:$0 sm:$0xff]  ;;  %v533_v39 = vld [vmem:[%s1293_s11] sm:$0xff]  ;;  %p1079_p12 = pnand %p1078_p11, %p1072_p8 }
  0x83   :  { %794 = vmatpush3.bf16.msra.mxu0 %v855_v7  ;;  %809 = vmatprep.mubr.msk.bf16.mxu0 %vm1118_vm0, %v1117_v0  ;;  %v736_v41 = vld [vmem:[#allocation14] ss:$0 sm:$0xff]  ;;  %v737_v43 = vld [vmem:[#allocation16] ss:$0 sm:$0xff]  ;;  %v747_v54 = vld [vmem:[%s1294_s12] ss:$0 sm:$0xff] }
  0x84   :  { %785 = vmatmul.mubr.msk.bf16.vlgmr.msra.gmra.mxu1 %vm262_vm2, %v170_v8  ;;  %795 = vmatprep.subr.bf16.mxu0 %v1117_v0 }
  0x85   :  { %834 = vmatprep.mubr.msk.bf16.mxu1 %vm1118_vm0, %v1117_v0  ;;  %819 = vmatpush3.bf16.msra.mxu1 %v863_v16 }
  0x86   :  { %820 = vmatprep.subr.bf16.mxu1 %v1117_v0 }
  0x87   :  { %796 = vmatpush3.bf16.msra.mxu0 %v856_v9 }
  0x88   :  { %797 = vmatprep.subr.bf16.mxu0 %v1117_v0 }
  0x89   :  { %821 = vmatpush3.bf16.msra.mxu1 %v864_v17 }
  0x8a   :  { %822 = vmatprep.subr.bf16.mxu1 %v1117_v0 }
  0x8b   :  { %798 = vmatpush3.bf16.msra.mxu0 %v857_v10 }
  0x8c   :  { %799 = vmatprep.subr.bf16.mxu0 %v1117_v0 }
  0x8d   :  { %823 = vmatpush3.bf16.msra.mxu1 %v865_v18 }
  0x8e   :  { %824 = vmatprep.subr.bf16.mxu1 %v1117_v0 }
  0x8f   :  { %800 = vmatpush3.bf16.msra.mxu0 %v858_v11 }
  0x90   :  { %801 = vmatprep.subr.bf16.mxu0 %v1117_v0 }
  0x91   :  { %825 = vmatpush3.bf16.msra.mxu1 %v866_v19 }
  0x92   :  { %826 = vmatprep.subr.bf16.mxu1 %v1117_v0 }
  0x93   :  { %802 = vmatpush3.bf16.msra.mxu0 %v859_v12 }
  0x94   :  { %803 = vmatprep.subr.bf16.mxu0 %v1117_v0 }
  0x95   :  { %827 = vmatpush3.bf16.msra.mxu1 %v867_v20 }
  0x96   :  { %828 = vmatprep.subr.bf16.mxu1 %v1117_v0 }
  0x97   :  { %804 = vmatpush3.bf16.msra.mxu0 %v860_v13 }
  0x98   :  { %805 = vmatprep.subr.bf16.mxu0 %v1117_v0 }
  0x99   :  { %829 = vmatpush3.bf16.msra.mxu1 %v868_v36 }
  0x9a   :  { %830 = vmatprep.subr.bf16.mxu1 %v1117_v0 }
  0x9b   :  { %806 = vmatpush3.bf16.msra.mxu0 %v861_v14 }
  0x9c   :  { %807 = vmatprep.subr.bf16.mxu0 %v1117_v0 }
  0x9d   :  { %831 = vmatpush3.bf16.msra.mxu1 %v869_v37 }
  0x9e   :  { %832 = vmatprep.subr.bf16.mxu1 %v1117_v0 }
  0x9f   :  { %808 = vmatpush3.bf16.msra.mxu0 %v862_v15 }
  0xa0   :  { %813 = vmatprep.subr.mxu0 %v1117_v0 }
  0xa1   :  { %833 = vmatpush3.bf16.msra.mxu1 %v870_v38 }
 0x13e   :  { %v246_v21 = vpop.f32.mrf.mxu0 }
 0x140   :  { %v779_v22 = vpop.f32.mrf.mxu0 }
 0x142   :  { %v407_v23 = vpop.f32.mrf.mxu0 }
 0x144   :  { %v300_v24 = vpop.f32.mrf.mxu1  ;;  %v792_v26 = vpop.f32.mrf.mxu0 }
 0x145   :  { %v301_v27 = vadd.f32 %v300_v24, %v246_v21 }
 0x146   :  { %v786_v29 = vpop.f32.mrf.mxu1 }
 0x147   :  { %v313_v30 = vmul.f32 %v725_v25, %v301_v27 }
 0x148   :  { %v303_v31 = vpop.f32.mrf.mxu1 }
 0x149   :  { %v321_v32 = vadd.f32 %v726_v28, %v313_v30 }
 0x14a   :  { %v787_v33 = vpop.f32.mrf.mxu1 }
 0x14b   :  { %v322_v34 = vmax.f32 %v321_v32, 0.0 }
 0x14d   :  { %v323_v35 = vpack.c.bf16 %v322_v34, %v322_v34 }
 0x14f   :  { %810 = vmatmul.mubr.bf16.vlgmr.msra.gmra.mxu0 %v323_v35 }
 0x150   :  { %815 = vmatprep.mubr.msk.f32.mxu0 %vm1118_vm0, %v1117_v0  ;;  %814 = vmatpush3.msra.mxu0 %v533_v39 }
 0x157   :  { %816 = vmatmul.mubr.msk.f32.vlgmr.msra.gmra.mxu0 %vm176_vm1, %v1235_v4 }
 0x20f   :  { %v493_v40 = vpop.f32.mrf.mxu0 }
 0x210   :  { %v494_v42 = vadd.f32 %v493_v40, %v407_v23 }
 0x211   :  { %v811_v44 = vpop.f32.mrf.mxu0 }
 0x212   :  { %v506_v45 = vmul.f32 %v736_v41, %v494_v42 }
 0x213   :  { %v496_v46 = vpop.f32.mrf.mxu0 }
 0x214   :  { %v514_v47 = vadd.f32 %v737_v43, %v506_v45 }
 0x215   :  { %v812_v48 = vpop.f32.mrf.mxu0 }
 0x216   :  { %v515_v49 = vmax.f32 %v514_v47, 0.0 }
 0x217   :  { %v600_v51 = vpop.f32.mrf.mxu0 }
 0x218   :  { %v516_v50 = vpack.c.bf16 %v515_v49, %v515_v49 }
 0x219   :  { %v817_v52 = vpop.f32.mrf.mxu0 }
 0x21a   :  { %835 = vmatmul.mubr.bf16.vlgmr.msra.gmra.mxu1 %v516_v50 }
 0x2da   :  { %v686_v53 = vpop.f32.mrf.mxu1 }
 0x2db   :  { %v687_v55 = vadd.f32 %v686_v53, %v600_v51 }
 0x2dc   :  { %v836_v56 = vpop.f32.mrf.mxu1 }
 0x2dd   :  { %v699_v57 = vadd.f32 %v747_v54, %v687_v55 }
 0x2de   :  { %v689_v58 = vpop.f32.mrf.mxu1 }
 0x2df   :  { %700 = vst [vmem:[#allocation19] sm:$0xff] %v699_v57 }
 0x2e0   :  { %v837_v59 = vpop.f32.mrf.mxu1 }
 0x2e1   :  { %1082 = shalt.err (!%p1079_p12)
}
 0x2e2   :  { %710 = dma.vmem_to_hbm [thread:$0]  %s708_s21, 128, %s1295_s13, [#allocation4]  }
 0x2e3   :  { %1103 = dma.done.wait [#allocation4], 128  }
 0x2e4   :  { %1104 = vsyncadd [#allocation4], 4294967168 }
 0x2e5   :  { %714 = vsyncpa [#allocation3], 1 }
 0x2e6   :  { %715 = vsyncpa [#allocation6], 1 }
 0x2e7   :  { %716 = vsyncpa [#allocation9], 1 }
 0x2e8   :  { %717 = vsyncpa [#allocation12], 1 }
 0x2e9   :  { %718 = vsyncpa [#allocation15], 1 }
 0x2ea   :  { %719 = vsyncpa [#allocation18], 1 }
 0x2eb   :  { %720 = vsyncpa [#allocation4], 1 }

// kernel: tpu_custom_call.1
= control target key start
LH: loop header
LB: loop body
LE: loop exit
PB: predicated region body
PF: predicated region fallthrough
CT: control target
= control target key end

     0   :  { %18 = vsyncpa [#allocation3], 0  ;;  %s1282_s0 = inlined_call_operand.hbm [shape: f32[8,32], index: 0, kind: input, shape index: {}]   ;;  %s1283_s1 = inlined_call_operand.hbm [shape: f32[8,8], index: 1, kind: input, shape index: {}]   ;;  %s1284_s2 = inlined_call_operand.hbm [shape: bf16[32,128], index: 2, kind: input, shape index: {}]   ;;  %s1285_s3 = inlined_call_operand.hbm [shape: f32[8,128], index: 3, kind: input, shape index: {}]   ;;  %s1286_s4 = inlined_call_operand.hbm [shape: f32[1,128], index: 4, kind: input, shape index: {}]   ;;  %s1287_s5 = inlined_call_operand.hbm [shape: f32[1,128], index: 5, kind: input, shape index: {}]   ;;  %s1288_s6 = inlined_call_operand.hbm [shape: bf16[128,128], index: 6, kind: input, shape index: {}]   ;;  %s1289_s7 = inlined_call_operand.vmem [shape: f32[8,128], index: 7, kind: input, shape index: {}]   ;;  %s1290_s8 = inlined_call_operand.hbm [shape: f32[1,128], index: 8, kind: input, shape index: {}]   ;;  %s1291_s9 = inlined_call_operand.hbm [shape: f32[1,128], index: 9, kind: input, shape index: {}]   ;;  %s1292_s10 = inlined_call_operand.hbm [shape: bf16[128,128], index: 10, kind: input, shape index: {}]   ;;  %s1293_s11 = inlined_call_operand.vmem [shape: f32[8,128], index: 11, kind: input, shape index: {}]   ;;  %s1294_s12 = inlined_call_operand.vmem [shape: f32[1,128], index: 12, kind: input, shape index: {}]   ;;  %s1295_s13 = inlined_call_operand.hbm [shape: f32[8,128], index: 13, kind: output, shape index: {}]  }
   0x1   :  { %19 = vsyncpa [#allocation6], 0 }
   0x2   :  { %20 = vsyncpa [#allocation9], 0 }
   0x3   :  { %21 = vsyncpa [#allocation12], 0 }
   0x4   :  { %22 = vsyncpa [#allocation15], 0 }
   0x5   :  { %23 = vsyncpa [#allocation18], 0 }
   0x6   :  { %24 = vsyncpa [#allocation4], 0  ;;  %s1105_s25 = smov [#allocation5]   ;;  %s1106_s27 = smov [#allocation8]  }
   0x7   :  { %s41_s26 = sshll.u32 %s1105_s25, 4  ;;  %s63_s28 = sshll.u32 %s1106_s27, 4  ;;  %s42_s26 = int_to_ptr.vmem [resolvable:$true] %s41_s26  ;;  %s64_s28 = int_to_ptr.vmem [resolvable:$true] %s63_s28 }
   0x8   :  { %s879_s29 = scalar_lea.vmem %s42_s26, 128  ;;  %p884_p1 = scmp.lt.s32.totalorder %s42_s26, %s42_s26 }
   0x9   :  { %p880_p0 = scmp.ne.s32.totalorder %s42_s26, %s879_s29  ;;  %p885_p2 = scmp.lt.s32.totalorder %s879_s29, %s879_s29 }
   0xb   :  { %p886_p3 = por %p885_p2, %p884_p1 }
   0xd   :  { %p887_p4 = pnand %p886_p3, %p880_p0 }
   0xf   :  { %890 = shalt.err (!%p887_p4)
}
  0x10   :  { %44 = dma.hbm_to_vmem [thread:$0]  %s1283_s1, 128, %s42_s26, [#allocation6]  }
  0x11   :  { %s899_s15 = scalar_lea.vmem %s64_s28, 128  ;;  %p904_p6 = scmp.lt.s32.totalorder %s64_s28, %s64_s28 }
  0x12   :  { %p900_p5 = scmp.ne.s32.totalorder %s64_s28, %s899_s15  ;;  %p905_p7 = scmp.lt.s32.totalorder %s899_s15, %s899_s15 }
  0x14   :  { %p906_p8 = por %p905_p7, %p904_p6 }
  0x16   :  { %p907_p9 = pnand %p906_p8, %p900_p5 }
  0x18   :  { %910 = shalt.err (!%p907_p9)
}
  0x19   :  { %66 = dma.hbm_to_vmem [thread:$0]  %s1285_s3, 128, %s64_s28, [#allocation9]  }
  0x1a   :  { %s1107_s18 = smov [#allocation11]   ;;  %s1108_s20 = smov [#allocation14]  }
  0x1b   :  { %s83_s19 = sshll.u32 %s1107_s18, 4  ;;  %s107_s21 = sshll.u32 %s1108_s20, 4  ;;  %s84_s19 = int_to_ptr.vmem [resolvable:$true] %s83_s19  ;;  %s108_s21 = int_to_ptr.vmem [resolvable:$true] %s107_s21 }
  0x1c   :  { %s919_s22 = scalar_lea.vmem %s84_s19, 16  ;;  %s923_s1 = scalar_lea.vmem %s84_s19, 32 }
  0x1d   :  { %p920_p10 = scmp.ne.s32.totalorder %s84_s19, %s919_s22  ;;  %p924_p11 = scmp.lt.s32.totalorder %s84_s19, %s84_s19 }
  0x1e   :  { %p925_p12 = scmp.lt.s32.totalorder %s923_s1, %s919_s22 }
  0x20   :  { %p926_p13 = por %p925_p12, %p924_p11 }
  0x22   :  { %p927_p0 = pnand %p926_p13, %p920_p10 }
  0x24   :  { %930 = shalt.err (!%p927_p0)
}
  0x25   :  { %86 = dma.hbm_to_vmem [thread:$0]  %s1287_s5, 16, %s84_s19, [#allocation12]  }
  0x26   :  { %s939_s25 = scalar_lea.vmem %s108_s21, 16  ;;  %s943_s3 = scalar_lea.vmem %s108_s21, 32 }
  0x27   :  { %p940_p1 = scmp.ne.s32.totalorder %s108_s21, %s939_s25  ;;  %p944_p2 = scmp.lt.s32.totalorder %s108_s21, %s108_s21 }
  0x28   :  { %p945_p3 = scmp.lt.s32.totalorder %s943_s3, %s939_s25 }
  0x2a   :  { %p946_p4 = por %p945_p3, %p944_p2 }
  0x2c   :  { %p947_p5 = pnand %p946_p4, %p940_p1 }
  0x2e   :  { %950 = shalt.err (!%p947_p5)
}
  0x2f   :  { %110 = dma.hbm_to_vmem [thread:$0]  %s1290_s8, 16, %s108_s21, [#allocation15]  }
  0x30   :  { %s1109_s28 = smov [#allocation2]   ;;  %s1110_s30 = smov [#allocation7]  }
  0x31   :  { %s31_s29 = sshll.u32 %s1109_s28, 4  ;;  %s50_s14 = sshll.u32 %s1110_s30, 4  ;;  %s32_s29 = int_to_ptr.vmem [resolvable:$true] %s31_s29  ;;  %s51_s14 = int_to_ptr.vmem [resolvable:$true] %s50_s14 }
  0x32   :  { %s959_s15 = scalar_lea.vmem %s32_s29, 128  ;;  %p964_p7 = scmp.lt.s32.totalorder %s32_s29, %s32_s29 }
  0x33   :  { %p960_p6 = scmp.ne.s32.totalorder %s32_s29, %s959_s15  ;;  %p965_p8 = scmp.lt.s32.totalorder %s959_s15, %s959_s15 }
  0x35   :  { %p966_p9 = por %p965_p8, %p964_p7 }
  0x37   :  { %p967_p10 = pnand %p966_p9, %p960_p6 }
  0x39   :  { %970 = shalt.err (!%p967_p10)
}
  0x3a   :  { %34 = dma.hbm_to_vmem [thread:$0]  %s1282_s0, 128, %s32_s29, [#allocation3]  }
  0x3b   :  { %s979_s17 = scalar_lea.vmem %s51_s14, 256  ;;  %p984_p12 = scmp.lt.s32.totalorder %s51_s14, %s51_s14 }
  0x3c   :  { %p980_p11 = scmp.ne.s32.totalorder %s51_s14, %s979_s17  ;;  %p985_p13 = scmp.lt.s32.totalorder %s979_s17, %s979_s17 }
  0x3e   :  { %p986_p0 = por %p985_p13, %p984_p12 }
  0x40   :  { %p987_p1 = pnand %p986_p0, %p980_p11 }
  0x42   :  { %990 = shalt.err (!%p987_p1)
}
  0x43   :  { %s1111_s8 = smov 64   ;;  %s1112_s18 = smov 4  }
  0x44   :  { %56 = dma.hbm_to_vmem [thread:$0]  %s1284_s2, 256, %s51_s14, [#allocation6], %s1111_s8, %s1111_s8, %s1112_s18  }
  0x45   :  { %s1113_s21 = smov [#allocation10]   ;;  %s1114_s1 = smov [#allocation13]  }
  0x46   :  { %s73_s22 = sshll.u32 %s1113_s21, 4  ;;  %s92_s0 = sshll.u32 %s1114_s1, 4  ;;  %s74_s22 = int_to_ptr.vmem [resolvable:$true] %s73_s22  ;;  %s93_s0 = int_to_ptr.vmem [resolvable:$true] %s92_s0 }
  0x47   :  { %s999_s23 = scalar_lea.vmem %s74_s22, 16  ;;  %s1003_s24 = scalar_lea.vmem %s74_s22, 32 }
  0x48   :  { %p1000_p2 = scmp.ne.s32.totalorder %s74_s22, %s999_s23  ;;  %p1004_p3 = scmp.lt.s32.totalorder %s74_s22, %s74_s22 }
  0x49   :  { %p1005_p4 = scmp.lt.s32.totalorder %s1003_s24, %s999_s23 }
  0x4b   :  { %p1006_p5 = por %p1005_p4, %p1004_p3 }
  0x4d   :  { %p1007_p6 = pnand %p1006_p5, %p1000_p2 }
  0x4f   :  { %1010 = shalt.err (!%p1007_p6)
}
  0x50   :  { %76 = dma.hbm_to_vmem [thread:$0]  %s1286_s4, 16, %s74_s22, [#allocation9]  }
  0x51   :  { %s1019_s26 = scalar_lea.vmem %s93_s0, 1024  ;;  %p1024_p8 = scmp.lt.s32.totalorder %s93_s0, %s93_s0 }
  0x52   :  { %p1020_p7 = scmp.ne.s32.totalorder %s93_s0, %s1019_s26  ;;  %p1025_p9 = scmp.lt.s32.totalorder %s1019_s26, %s1019_s26 }
  0x54   :  { %p1026_p10 = por %p1025_p9, %p1024_p8 }
  0x56   :  { %p1027_p11 = pnand %p1026_p10, %p1020_p7 }
  0x58   :  { %1030 = shalt.err (!%p1027_p11)
}
  0x59   :  { %98 = dma.hbm_to_vmem [thread:$0]  %s1288_s6, 1024, %s93_s0, [#allocation12], %s1111_s8, %s1111_s8, %s1112_s18  }
  0x5a   :  { %s1115_s28 = smov [#allocation16]   ;;  %s1116_s30 = smov [#allocation17]  }
  0x5b   :  { %s117_s29 = sshll.u32 %s1115_s28, 4  ;;  %s126_s14 = sshll.u32 %s1116_s30, 4  ;;  %s118_s29 = int_to_ptr.vmem [resolvable:$true] %s117_s29  ;;  %s127_s14 = int_to_ptr.vmem [resolvable:$true] %s126_s14 }
  0x5c   :  { %s1039_s4 = scalar_lea.vmem %s118_s29, 16  ;;  %s1043_s15 = scalar_lea.vmem %s118_s29, 32 }
  0x5d   :  { %p1040_p12 = scmp.ne.s32.totalorder %s118_s29, %s1039_s4  ;;  %p1044_p13 = scmp.lt.s32.totalorder %s118_s29, %s118_s29 }
  0x5e   :  { %p1045_p0 = scmp.lt.s32.totalorder %s1043_s15, %s1039_s4 }
  0x60   :  { %p1046_p1 = por %p1045_p0, %p1044_p13 }
  0x62   :  { %p1047_p2 = pnand %p1046_p1, %p1040_p12 }
  0x64   :  { %1050 = shalt.err (!%p1047_p2)
}
  0x65   :  { %120 = dma.hbm_to_vmem [thread:$0]  %s1291_s9, 16, %s118_s29, [#allocation15]  }
  0x66   :  { %s1059_s17 = scalar_lea.vmem %s127_s14, 1024  ;;  %p1064_p4 = scmp.lt.s32.totalorder %s127_s14, %s127_s14 }
  0x67   :  { %p1060_p3 = scmp.ne.s32.totalorder %s127_s14, %s1059_s17  ;;  %p1065_p5 = scmp.lt.s32.totalorder %s1059_s17, %s1059_s17 }
  0x69   :  { %p1066_p6 = por %p1065_p5, %p1064_p4 }
  0x6b   :  { %p1067_p7 = pnand %p1066_p6, %p1060_p3 }
  0x6d   :  { %1070 = shalt.err (!%p1067_p7)
}
  0x6e   :  { %132 = dma.hbm_to_vmem [thread:$0]  %s1292_s10, 1024, %s127_s14, [#allocation18], %s1111_s8, %s1111_s8, %s1112_s18  }
  0x6f   :  { %1091 = dma.done.wait [#allocation3], 128  }
  0x70   :  { %1092 = vsyncadd [#allocation3], 4294967168 }
  0x71   :  { %1093 = dma.done.wait [#allocation6], 384  }
  0x72   :  { %1094 = vsyncadd [#allocation6], 4294966912 }
  0x73   :  { %1095 = dma.done.wait [#allocation9], 144  }
  0x74   :  { %1096 = vsyncadd [#allocation9], 4294967152 }
  0x75   :  { %1097 = dma.done.wait [#allocation12], 1040  }
  0x76   :  { %1098 = vsyncadd [#allocation12], 4294966256 }
  0x77   :  { %1099 = dma.done.wait [#allocation15], 32  }
  0x78   :  { %1100 = vsyncadd [#allocation15], 4294967264 }
  0x79   :  { %1101 = dma.done.wait [#allocation18], 1024  }
  0x7a   :  { %1102 = vsyncadd [#allocation18], 4294966272  ;;  %v1117_v0 = vmov 0.0   ;;  %vm1118_vm0 = vmmov 0   ;;  %v853_v1 = vld [vmem:[#allocation7 + $0x8] sm:$0xff]   ;;  %vm176_vm1 = vcmask 64512  }
  0x7b   :  { %780 = vmatprep.subr.bf16.mxu1 %v1117_v0  ;;  %775 = vmatprep.subr.mxu0 %v1117_v0  ;;  %v175_v2 = vld [vmem:[#allocation8] sm:$0xff]  ;;  %v854_v3 = vld [vmem:[#allocation7] sm:$0xff]   ;;  %v1235_v4 = vld [vmem:[#allocation5] sm:$0xff]  ;;  %vm262_vm2 = vcmask 261120   ;;  %s1119_s20 = smov [#allocation19]  }
  0x7c   :  { %777 = vmatprep.mubr.msk.f32.mxu0 %vm1118_vm0, %v1117_v0  ;;  %784 = vmatprep.mubr.msk.bf16.mxu1 %vm1118_vm0, %v1117_v0  ;;  %v169_v5 = vld [vmem:[#allocation2] sm:$0xff]  ;;  %v857_v10 = vld [vmem:[#allocation13 + $0x28] sm:$0xff]   ;;  %v858_v11 = vld [vmem:[#allocation13 + $0x20] sm:$0xff]   ;;  %s707_s21 = sshll.u32 %s1119_s20, 4  ;;  %s708_s21 = int_to_ptr.vmem [resolvable:$true] %s707_s21 }
  0x7d   :  { %781 = vmatpush3.bf16.msra.mxu1 %v853_v1  ;;  %776 = vmatpush3.msra.mxu0 %v175_v2  ;;  %v340_v6 = vld [vmem:[%s1289_s7] sm:$0xff]  ;;  %v170_v8 = vpack.c.bf16 %v169_v5, %v169_v5  ;;  %v861_v14 = vld [vmem:[#allocation13 + $0x8] sm:$0xff]   ;;  %v862_v15 = vld [vmem:[#allocation13] sm:$0xff]   ;;  %s1071_s22 = scalar_lea.vmem %s708_s21, 128  ;;  %p1076_p9 = scmp.lt.s32.totalorder %s708_s21, %s708_s21 }
  0x7e   :  { %782 = vmatprep.subr.bf16.mxu1 %v1117_v0  ;;  %778 = vmatmul.mubr.msk.f32.vlgmr.msra.gmra.mxu0 %vm176_vm1, %v1235_v4  ;;  %v855_v7 = vld [vmem:[#allocation13 + $0x38] sm:$0xff]   ;;  %v856_v9 = vld [vmem:[#allocation13 + $0x30] sm:$0xff]   ;;  %v866_v19 = vld [vmem:[#allocation17 + $0x20] sm:$0xff]   ;;  %p1072_p8 = scmp.ne.s32.totalorder %s708_s21, %s1071_s22  ;;  %p1077_p10 = scmp.lt.s32.totalorder %s1071_s22, %s1071_s22 }
  0x7f   :  { %788 = vmatprep.subr.mxu0 %v1117_v0  ;;  %790 = vmatprep.mubr.msk.f32.mxu0 %vm1118_vm0, %v1117_v0  ;;  %v859_v12 = vld [vmem:[#allocation13 + $0x18] sm:$0xff]   ;;  %v860_v13 = vld [vmem:[#allocation13 + $0x10] sm:$0xff]   ;;  %v870_v38 = vld [vmem:[#allocation17] sm:$0xff]  }
  0x80   :  { %789 = vmatpush3.msra.mxu0 %v340_v6  ;;  %v863_v16 = vld [vmem:[#allocation17 + $0x38] sm:$0xff]   ;;  %v864_v17 = vld [vmem:[#allocation17 + $0x30] sm:$0xff]   ;;  %v865_v18 = vld [vmem:[#allocation17 + $0x28] sm:$0xff]   ;;  %p1078_p11 = por %p1077_p10, %p1076_p9 }
  0x81   :  { %783 = vmatpush3.bf16.msra.mxu1 %v854_v3  ;;  %793 = vmatprep.subr.bf16.mxu0 %v1117_v0  ;;  %v867_v20 = vld [vmem:[#allocation17 + $0x18] sm:$0xff]   ;;  %v868_v36 = vld [vmem:[#allocation17 + $0x10] sm:$0xff]   ;;  %v869_v37 = vld [vmem:[#allocation17 + $0x8] sm:$0xff]  }
  0x82   :  { %791 = vmatmul.mubr.msk.f32.vlgmr.msra.gmra.mxu0 %vm176_vm1, %v1235_v4  ;;  %818 = vmatprep.subr.bf16.mxu1 %v1117_v0  ;;  %v725_v25 = vld [vmem:[#allocation10] ss:$0 sm:$0xff]  ;;  %v726_v28 = vld [vmem:[#allocation11] ss:$0 sm:$0xff]  ;;  %v533_v39 = vld [vmem:[%s1293_s11] sm:$0xff]  ;;  %p1079_p12 = pnand %p1078_p11, %p1072_p8 }
  0x83   :  { %794 = vmatpush3.bf16.msra.mxu0 %v855_v7  ;;  %809 = vmatprep.mubr.msk.bf16.mxu0 %vm1118_vm0, %v1117_v0  ;;  %v736_v41 = vld [vmem:[#allocation14] ss:$0 sm:$0xff]  ;;  %v737_v43 = vld [vmem:[#allocation16] ss:$0 sm:$0xff]  ;;  %v747_v54 = vld [vmem:[%s1294_s12] ss:$0 sm:$0xff] }
  0x84   :  { %785 = vmatmul.mubr.msk.bf16.vlgmr.msra.gmra.mxu1 %vm262_vm2, %v170_v8  ;;  %795 = vmatprep.subr.bf16.mxu0 %v1117_v0 }
  0x85   :  { %834 = vmatprep.mubr.msk.bf16.mxu1 %vm1118_vm0, %v1117_v0  ;;  %819 = vmatpush3.bf16.msra.mxu1 %v863_v16 }
  0x86   :  { %820 = vmatprep.subr.bf16.mxu1 %v1117_v0 }
  0x87   :  { %796 = vmatpush3.bf16.msra.mxu0 %v856_v9 }
  0x88   :  { %797 = vmatprep.subr.bf16.mxu0 %v1117_v0 }
  0x89   :  { %821 = vmatpush3.bf16.msra.mxu1 %v864_v17 }
  0x8a   :  { %822 = vmatprep.subr.bf16.mxu1 %v1117_v0 }
  0x8b   :  { %798 = vmatpush3.bf16.msra.mxu0 %v857_v10 }
  0x8c   :  { %799 = vmatprep.subr.bf16.mxu0 %v1117_v0 }
  0x8d   :  { %823 = vmatpush3.bf16.msra.mxu1 %v865_v18 }
  0x8e   :  { %824 = vmatprep.subr.bf16.mxu1 %v1117_v0 }
  0x8f   :  { %800 = vmatpush3.bf16.msra.mxu0 %v858_v11 }
  0x90   :  { %801 = vmatprep.subr.bf16.mxu0 %v1117_v0 }
  0x91   :  { %825 = vmatpush3.bf16.msra.mxu1 %v866_v19 }
  0x92   :  { %826 = vmatprep.subr.bf16.mxu1 %v1117_v0 }
  0x93   :  { %802 = vmatpush3.bf16.msra.mxu0 %v859_v12 }
  0x94   :  { %803 = vmatprep.subr.bf16.mxu0 %v1117_v0 }
  0x95   :  { %827 = vmatpush3.bf16.msra.mxu1 %v867_v20 }
  0x96   :  { %828 = vmatprep.subr.bf16.mxu1 %v1117_v0 }
  0x97   :  { %804 = vmatpush3.bf16.msra.mxu0 %v860_v13 }
  0x98   :  { %805 = vmatprep.subr.bf16.mxu0 %v1117_v0 }
  0x99   :  { %829 = vmatpush3.bf16.msra.mxu1 %v868_v36 }
  0x9a   :  { %830 = vmatprep.subr.bf16.mxu1 %v1117_v0 }
  0x9b   :  { %806 = vmatpush3.bf16.msra.mxu0 %v861_v14 }
  0x9c   :  { %807 = vmatprep.subr.bf16.mxu0 %v1117_v0 }
  0x9d   :  { %831 = vmatpush3.bf16.msra.mxu1 %v869_v37 }
  0x9e   :  { %832 = vmatprep.subr.bf16.mxu1 %v1117_v0 }
  0x9f   :  { %808 = vmatpush3.bf16.msra.mxu0 %v862_v15 }
  0xa0   :  { %813 = vmatprep.subr.mxu0 %v1117_v0 }
  0xa1   :  { %833 = vmatpush3.bf16.msra.mxu1 %v870_v38 }
 0x13e   :  { %v246_v21 = vpop.f32.mrf.mxu0 }
 0x140   :  { %v779_v22 = vpop.f32.mrf.mxu0 }
 0x142   :  { %v407_v23 = vpop.f32.mrf.mxu0 }
 0x144   :  { %v300_v24 = vpop.f32.mrf.mxu1  ;;  %v792_v26 = vpop.f32.mrf.mxu0 }
 0x145   :  { %v301_v27 = vadd.f32 %v300_v24, %v246_v21 }
 0x146   :  { %v786_v29 = vpop.f32.mrf.mxu1 }
 0x147   :  { %v313_v30 = vmul.f32 %v725_v25, %v301_v27 }
 0x148   :  { %v303_v31 = vpop.f32.mrf.mxu1 }
 0x149   :  { %v321_v32 = vadd.f32 %v726_v28, %v313_v30 }
 0x14a   :  { %v787_v33 = vpop.f32.mrf.mxu1 }
 0x14b   :  { %v322_v34 = vmax.f32 %v321_v32, 0.0 }
 0x14d   :  { %v323_v35 = vpack.c.bf16 %v322_v34, %v322_v34 }
 0x14f   :  { %810 = vmatmul.mubr.bf16.vlgmr.msra.gmra.mxu0 %v323_v35 }
 0x150   :  { %815 = vmatprep.mubr.msk.f32.mxu0 %vm1118_vm0, %v1117_v0  ;;  %814 = vmatpush3.msra.mxu0 %v533_v39 }
 0x157   :  { %816 = vmatmul.mubr.msk.f32.vlgmr.msra.gmra.mxu0 %vm176_vm1, %v1235_v4 }
 0x20f   :  { %v493_v40 = vpop.f32.mrf.mxu0 }
 0x210   :  { %v494_v42 = vadd.f32 %v493_v40, %v407_v23 }
 0x211   :  { %v811_v44 = vpop.f32.mrf.mxu0 }
 0x212   :  { %v506_v45 = vmul.f32 %v736_v41, %v494_v42 }
 0x213   :  { %v496_v46 = vpop.f32.mrf.mxu0 }
 0x214   :  { %v514_v47 = vadd.f32 %v737_v43, %v506_v45 }
 0x215   :  { %v812_v48 = vpop.f32.mrf.mxu0 }
 0x216   :  { %v515_v49 = vmax.f32 %v514_v47, 0.0 }
 0x217   :  { %v600_v51 = vpop.f32.mrf.mxu0 }
 0x218   :  { %v516_v50 = vpack.c.bf16 %v515_v49, %v515_v49 }
 0x219   :  { %v817_v52 = vpop.f32.mrf.mxu0 }
 0x21a   :  { %835 = vmatmul.mubr.bf16.vlgmr.msra.gmra.mxu1 %v516_v50 }
 0x2da   :  { %v686_v53 = vpop.f32.mrf.mxu1 }
 0x2db   :  { %v687_v55 = vadd.f32 %v686_v53, %v600_v51 }
 0x2dc   :  { %v836_v56 = vpop.f32.mrf.mxu1 }
 0x2dd   :  { %v699_v57 = vadd.f32 %v747_v54, %v687_v55 }
 0x2de   :  { %v689_v58 = vpop.f32.mrf.mxu1 }
 0x2df   :  { %700 = vst [vmem:[#allocation19] sm:$0xff] %v699_v57 }
 0x2e0   :  { %v837_v59 = vpop.f32.mrf.mxu1 }
 0x2e1   :  { %1082 = shalt.err (!%p1079_p12)
}
 0x2e2   :  { %710 = dma.vmem_to_hbm [thread:$0]  %s708_s21, 128, %s1295_s13, [#allocation4]  }
 0x2e3   :  { %1103 = dma.done.wait [#allocation4], 128  }
 0x2e4   :  { %1104 = vsyncadd [#allocation4], 4294967168 }
 0x2e5   :  { %714 = vsyncpa [#allocation3], 1 }
 0x2e6   :  { %715 = vsyncpa [#allocation6], 1 }
 0x2e7   :  { %716 = vsyncpa [#allocation9], 1 }
 0x2e8   :  { %717 = vsyncpa [#allocation12], 1 }
 0x2e9   :  { %718 = vsyncpa [#allocation15], 1 }
 0x2ea   :  { %719 = vsyncpa [#allocation18], 1 }
 0x2eb   :  { %720 = vsyncpa [#allocation4], 1 }

</bundles_post_ra>
